<compile_context>
chip_gen: v7x
topology: tpu7x:2x2x1
jax: 0.10.0
libtpu: 0.0.40
codegen_flags: <defaults>
</compile_context>

<pallas_src>
import jax
import jax.numpy as jnp
from jax.experimental import pallas as pl
from jax.experimental.pallas import tpu as pltpu


def _sage_encoder_kernel(a_ref, x0_ref, w_ref, b_ref, out_ref, xbuf_ref):
    """One grid step == one SAGEResBlock layer (grid axis 0 = layer index).

    a_ref   : [N, N]            bf16 row-normalized adjacency (VMEM-resident)
    x0_ref  : [N, Cpad]         f32  padded input features (consumed at layer 0)
    w_ref   : [1, 2*Cpad, Cpad] bf16 fused weight [[lin_l], [lin_r + skip]]
    b_ref   : [1, 1, Cpad]      f32  bias
    out_ref : [N, Cpad]         f32  final-layer output (written once)
    xbuf_ref: [N, Cpad]         f32  VMEM scratch carrying x across layers
    """
    layer = pl.program_id(0)

    @pl.when(layer == 0)
    def _():
        xbuf_ref[...] = x0_ref[...]

    x = xbuf_ref[...]                                      # f32 [N, Cpad]
    # mean aggregation over in-neighbors: agg = A @ x  (bf16 in, f32 acc)
    agg = jnp.dot(a_ref[...], x.astype(jnp.bfloat16),
                  preferred_element_type=jnp.float32)      # f32 [N, Cpad]
    # single fused feature matmul: [agg | x] @ [[wl], [wr + ws]]
    feat = jnp.concatenate([agg, x], axis=-1).astype(jnp.bfloat16)
    h = jnp.dot(feat, w_ref[0], preferred_element_type=jnp.float32)
    h = jnp.maximum(h + b_ref[0], 0.0)                     # f32 elementwise tail

    xbuf_ref[...] = h                                      # carry to next layer

    @pl.when(layer == pl.num_programs(0) - 1)
    def _():
        out_ref[...] = h


def _round_up(v, m):
    return (v + m - 1) // m * m


def build_norm_adj(edge_index, num_nodes):
    """Dense row-normalized adjacency A with A[dst, src] = 1/deg_in(dst)."""
    src = edge_index[0]
    dst = edge_index[1]
    a = jnp.zeros((num_nodes, num_nodes), jnp.float32)
    a = a.at[dst, src].add(1.0)
    deg = jnp.sum(a, axis=1, keepdims=True)
    return a / jnp.maximum(deg, 1.0)


def pack_params(params, c_pad):
    """Stack per-layer weights into lane-dense fused tensors.

    Each layer (wl, wr, b, ws) with shapes [Cin,Cout]/[1,Cout] becomes
      W[l] = [[wl_pad], [(wr + ws)_pad]] : [2*Cpad, Cpad]  (bf16)
      B[l] = b_pad                        : [1, Cpad]       (f32)
    Zero padding of unused rows/cols keeps the padded math exact.
    """
    w_stack, b_stack = [], []
    for wl, wr, b, ws in params:
        c_in, c_out = wl.shape
        top = jnp.zeros((c_pad, c_pad), jnp.float32).at[:c_in, :c_out].set(wl)
        bot = jnp.zeros((c_pad, c_pad), jnp.float32).at[:c_in, :c_out].set(wr + ws)
        w_stack.append(jnp.concatenate([top, bot], axis=0))
        b_stack.append(jnp.zeros((1, c_pad), jnp.float32).at[:, :c_out].set(b))
    w = jnp.stack(w_stack).astype(jnp.bfloat16)   # [L, 2*Cpad, Cpad]
    b = jnp.stack(b_stack)                        # [L, 1, Cpad] f32
    return w, b


def sage_encoder_block(x, edge_index, params):
    """Forward pass of SAGEEncoderBlock: L fused SAGEResBlocks in one kernel."""
    n = x.shape[0]
    num_layers = len(params)
    c_out_last = params[-1][0].shape[1]
    c_pad = _round_up(max([x.shape[1]] + [p[0].shape[1] for p in params]), 128)

    a = build_norm_adj(edge_index, n).astype(jnp.bfloat16)
    x_pad = jnp.zeros((n, c_pad), jnp.float32).at[:, :x.shape[1]].set(x)
    w, b = pack_params(params, c_pad)

    out = pl.pallas_call(
        _sage_encoder_kernel,
        out_shape=jax.ShapeDtypeStruct((n, c_pad), jnp.float32),
        grid=(num_layers,),
        in_specs=[
            # A and x0: constant index_map -> DMA'd once, VMEM-resident
            # across every layer of the grid.
            pl.BlockSpec((n, n), lambda l: (0, 0)),
            pl.BlockSpec((n, c_pad), lambda l: (0, 0)),
            # Per-layer fused weight / bias (auto double-buffered by Pallas,
            # so layer l+1 weights prefetch while layer l computes).
            pl.BlockSpec((1, 2 * c_pad, c_pad), lambda l: (l, 0, 0)),
            pl.BlockSpec((1, 1, c_pad), lambda l: (l, 0, 0)),
        ],
        out_specs=pl.BlockSpec((n, c_pad), lambda l: (0, 0)),
        scratch_shapes=[pltpu.VMEM((n, c_pad), jnp.float32)],
        compiler_params=pltpu.CompilerParams(
            # Layer axis is a sequential carried recurrence (x feeds forward),
            # so it must be "arbitrary"; cross-core parallelism would only
            # apply to a per-layer row-tiled variant at large N (see TODO).
            dimension_semantics=("arbitrary",)),
    )(a, x_pad, w, b)

    return out[:, :c_out_last], edge_index


def init_params(channels, key):
    """Deterministic synthetic weights matching SAGEResBlock shapes."""
    params = []
    for c_in, c_out in zip(channels, channels[1:]):
        key, k1, k2, k3 = jax.random.split(key, 4)
        wl = 0.1 * jax.random.normal(k1, (c_in, c_out), jnp.float32)
        wr = 0.1 * jax.random.normal(k2, (c_in, c_out), jnp.float32)
        ws = 0.1 * jax.random.normal(k3, (c_in, c_out), jnp.float32)
        b = jnp.zeros((1, c_out), jnp.float32)
        params.append((wl, wr, b, ws))
    return params


if __name__ == "__main__":
    key = jax.random.PRNGKey(0)
    kx, ke, kp = jax.random.split(key, 3)

    num_nodes = 64
    num_edges = 256
    channels = [8, 16, 32]

    x = jax.random.normal(kx, (num_nodes, channels[0]), jnp.float32)
    edge_index = jax.random.randint(
        ke, (2, num_edges), 0, num_nodes, dtype=jnp.int32)

    params = init_params(channels, kp)

    out_x, out_edge_index = sage_encoder_block(x, edge_index, params)
    jax.block_until_ready(out_x)

    assert out_x.shape == (num_nodes, channels[-1])
    assert out_edge_index.shape == (2, num_edges)
    print("KERNEL_OK")
</pallas_src>

<mosaic_0001>
module attributes {stable_mosaic.version = 11 : i64} {
  func.func @_sage_encoder_kernel(%arg0: i32, %arg1: memref<64x64xbf16, #tpu.memory_space<vmem>>, %arg2: memref<64x128xf32, #tpu.memory_space<vmem>>, %arg3: memref<1x256x128xbf16, #tpu.memory_space<vmem>>, %arg4: memref<1x1x128xf32, #tpu.memory_space<vmem>>, %arg5: memref<64x128xf32, #tpu.memory_space<vmem>>, %arg6: memref<64x128xf32, #tpu.memory_space<vmem>>) attributes {dimension_semantics = [#tpu.dimension_semantics<arbitrary>], iteration_bounds = array<i64: 2>, scalar_prefetch = 0 : i64, scratch_operands = 1 : i64, tpu.core_type = #tpu.core_type<tc>, window_params = [{pipeline_mode = #tpu.pipeline_mode<synchronous>, transform_indices = @transform_0, window_bounds = array<i64: 64, 64>}, {pipeline_mode = #tpu.pipeline_mode<synchronous>, transform_indices = @transform_1, window_bounds = array<i64: 64, 128>}, {transform_indices = @transform_2, window_bounds = array<i64: 1, 256, 128>}, {transform_indices = @transform_3, window_bounds = array<i64: 1, 1, 128>}, {pipeline_mode = #tpu.pipeline_mode<synchronous>, transform_indices = @transform_4, window_bounds = array<i64: 64, 128>}]} {
    %c0_i32 = arith.constant 0 : i32
    %0 = arith.cmpi eq, %arg0, %c0_i32 : i32
    %1 = arith.extui %0 : i1 to i32
    %c0_i32_0 = arith.constant 0 : i32
    %2 = arith.cmpi ne, %1, %c0_i32_0 : i32
    scf.if %2 {
      %c0_15 = arith.constant 0 : index
      %c0_16 = arith.constant 0 : index
      %22 = vector.load %arg2[%c0_15, %c0_16] : memref<64x128xf32, #tpu.memory_space<vmem>>, vector<64x128xf32>
      %c0_17 = arith.constant 0 : index
      %c0_18 = arith.constant 0 : index
      %23 = vector.load %arg6[%c0_17, %c0_18] : memref<64x128xf32, #tpu.memory_space<vmem>>, vector<64x128xf32>
      tpu.vector_store %arg6[%c0_17, %c0_18], %22 {strides = array<i32>} : memref<64x128xf32, #tpu.memory_space<vmem>>, vector<64x128xf32>,
    } else {
    }
    %c0 = arith.constant 0 : index
    %c0_1 = arith.constant 0 : index
    %3 = vector.load %arg6[%c0, %c0_1] : memref<64x128xf32, #tpu.memory_space<vmem>>, vector<64x128xf32>
    %c0_2 = arith.constant 0 : index
    %c0_3 = arith.constant 0 : index
    %4 = vector.load %arg1[%c0_2, %c0_3] : memref<64x64xbf16, #tpu.memory_space<vmem>>, vector<64x64xbf16>
    %5 = arith.truncf %3 : vector<64x128xf32> to vector<64x128xbf16>
    %cst = arith.constant dense<0.000000e+00> : vector<64x128xf32>
    %6 = tpu.matmul %4, %5, %cst {dimension_numbers = #tpu.dot_dimension_numbers<[1], [0], [0], [1], [0, 0, 1, 1], [], []>} : vector<64x64xbf16>, vector<64x128xbf16>, vector<64x128xf32> -> vector<64x128xf32>
    %7 = tpu.concatenate %6, %3 in 1 : vector<64x128xf32>, vector<64x128xf32> -> vector<64x256xf32>
    %8 = arith.truncf %7 : vector<64x256xf32> to vector<64x256xbf16>
    %c0_4 = arith.constant 0 : index
    %c0_5 = arith.constant 0 : index
    %c0_6 = arith.constant 0 : index
    %9 = vector.load %arg3[%c0_4, %c0_5, %c0_6] : memref<1x256x128xbf16, #tpu.memory_space<vmem>>, vector<1x256x128xbf16>
    %10 = vector.shape_cast %9 : vector<1x256x128xbf16> to vector<256x128xbf16>
    %cst_7 = arith.constant dense<0.000000e+00> : vector<64x128xf32>
    %11 = tpu.matmul %8, %10, %cst_7 {dimension_numbers = #tpu.dot_dimension_numbers<[1], [0], [0], [1], [0, 0, 1, 1], [], []>} : vector<64x256xbf16>, vector<256x128xbf16>, vector<64x128xf32> -> vector<64x128xf32>
    %c0_8 = arith.constant 0 : index
    %c0_9 = arith.constant 0 : index
    %c0_10 = arith.constant 0 : index
    %12 = vector.load %arg4[%c0_8, %c0_9, %c0_10] : memref<1x1x128xf32, #tpu.memory_space<vmem>>, vector<1x1x128xf32>
    %13 = vector.shape_cast %12 : vector<1x1x128xf32> to vector<1x128xf32>
    %14 = vector.broadcast %13 : vector<1x128xf32> to vector<64x128xf32>
    %15 = arith.addf %11, %14 : vector<64x128xf32>
    %cst_11 = arith.constant 0.000000e+00 : f32
    %16 = vector.broadcast %cst_11 : f32 to vector<64x128xf32>
    %17 = arith.maximumf %15, %16 : vector<64x128xf32>
    %c0_12 = arith.constant 0 : index
    %c0_13 = arith.constant 0 : index
    %18 = vector.load %arg6[%c0_12, %c0_13] : memref<64x128xf32, #tpu.memory_space<vmem>>, vector<64x128xf32>
    tpu.vector_store %arg6[%c0_12, %c0_13], %17 {strides = array<i32>} : memref<64x128xf32, #tpu.memory_space<vmem>>, vector<64x128xf32>,
    %c1_i32 = arith.constant 1 : i32
    %19 = arith.cmpi eq, %arg0, %c1_i32 : i32
    %20 = arith.extui %19 : i1 to i32
    %c0_i32_14 = arith.constant 0 : i32
    %21 = arith.cmpi ne, %20, %c0_i32_14 : i32
    scf.if %21 {
      %c0_15 = arith.constant 0 : index
      %c0_16 = arith.constant 0 : index
      %22 = vector.load %arg5[%c0_15, %c0_16] : memref<64x128xf32, #tpu.memory_space<vmem>>, vector<64x128xf32>
      tpu.vector_store %arg5[%c0_15, %c0_16], %17 {strides = array<i32>} : memref<64x128xf32, #tpu.memory_space<vmem>>, vector<64x128xf32>,
    } else {
    }
    return
  }
  func.func @transform_0(%arg0: i32) -> (i32, i32) {
    %c0_i32 = arith.constant 0 : i32
    %c0_i32_0 = arith.constant 0 : i32
    %c0_i32_1 = arith.constant 0 : i32
    return %c0_i32, %c0_i32_0 : i32, i32
  }
  func.func @transform_1(%arg0: i32) -> (i32, i32) {
    %c0_i32 = arith.constant 0 : i32
    %c0_i32_0 = arith.constant 0 : i32
    %c0_i32_1 = arith.constant 0 : i32
    return %c0_i32, %c0_i32_0 : i32, i32
  }
  func.func @transform_2(%arg0: i32) -> (i32, i32, i32) {
    %c0_i32 = arith.constant 0 : i32
    %c0_i32_0 = arith.constant 0 : i32
    %c0_i32_1 = arith.constant 0 : i32
    return %arg0, %c0_i32, %c0_i32_0 : i32, i32, i32
  }
  func.func @transform_3(%arg0: i32) -> (i32, i32, i32) {
    %c0_i32 = arith.constant 0 : i32
    %c0_i32_0 = arith.constant 0 : i32
    %c0_i32_1 = arith.constant 0 : i32
    return %arg0, %c0_i32, %c0_i32_0 : i32, i32, i32
  }
  func.func @transform_4(%arg0: i32) -> (i32, i32) {
    %c0_i32 = arith.constant 0 : i32
    %c0_i32_0 = arith.constant 0 : i32
    %c0_i32_1 = arith.constant 0 : i32
    return %c0_i32, %c0_i32_0 : i32, i32
  }
}

</mosaic_0001>

<bundles_post_ra>
// kernel: tpu_custom_call.1
= control target key start
LH: loop header
LB: loop body
LE: loop exit
PB: predicated region body
PF: predicated region fallthrough
CT: control target
= control target key end

     0   :  { %9 = vsyncpa [#allocation4], 0  ;;  %s1368_s0 = inlined_call_operand.hbm [shape: bf16[64,64], index: 0, kind: input, shape index: {}]   ;;  %s1369_s1 = inlined_call_operand.hbm [shape: f32[64,128], index: 1, kind: input, shape index: {}]   ;;  %s1370_s2 = inlined_call_operand.hbm [shape: bf16[2,256,128], index: 2, kind: input, shape index: {}]   ;;  %s1371_s3 = inlined_call_operand.vmem [shape: f32[2,1,128], index: 3, kind: input, shape index: {}]   ;;  %s1372_s4 = inlined_call_operand.hbm [shape: f32[64,128], index: 4, kind: output, shape index: {}]  }
   0x1   :  { %10 = vsyncpa [#allocation7], 0 }
   0x2   :  { %11 = vsyncpa [#allocation5], 0  ;;  %s1115_s15 = smov 0   ;;  %s1117_s16 = smov 0  }
   0x3   :  { %s1119_s17 = smov 0   ;;  %s1121_s18 = smov 0  }
   0x4 LB: > { %s1134_s19 = sadd.s32 4294967295, %s1078_s18   ;;  %s1137_s20 = sadd.s32 1, %s1078_s18   ;;  %s1078_s18 = sphi %s1121_s18, %s1393_s18   ;;  %s1074_s17 = sphi %s1119_s17, %s1392_s17   ;;  %s1070_s16 = sphi %s1117_s16, %s1391_s16   ;;  %s1066_s15 = sphi %s1115_s15, %s1390_s15  }
   0x5   : > { %s63_s21 = ssub.s32 %s1078_s18, %s1137_s20  ;;  %s66_s22 = sadd.s32 1, %s1074_s17 }
   0x6   : > { %p64_p0 = scmp.eq.s32.totalorder %s63_s21, 0  ;;  %p73_p1 = scmp.ne.s32.totalorder %s1074_s17, %s1070_s16 }
   0x7   : > { %p74_p2 = scmp.eq.s32.totalorder %s1078_s18, 0  ;;  %p79_p3 = scmp.ne.s32.totalorder %s1070_s16, %s1066_s15 }
   0x8   : > { %s1147_s23 = scalar_select %p64_p0, %s1074_s17, %s66_s22  }
   0x9   : > { %p1149_p4 = por %p74_p2, %p73_p1  ;;  %p1373_p5 = scmp.eq.s32.totalorder %s1134_s19, 0 }
   0xa   : > { %p704_p6 = scmp.ge.s32.totalorder %s1078_s18, 1  ;;  %p137_p7 = scmp.lt.s32.totalorder %s1078_s18, 3 }
   0xb   : > { %p1158_p8 = por %p1373_p5, %p79_p3  ;;  %s1080_s27 = smov [#allocation3]  }
   0xc   : > { %p1163_p10 = pnand %p704_p6, %p137_p7  ;;  %s149_s28 = sshll.u32 %s1080_s27, 4  ;;  %s150_s28 = int_to_ptr.vmem [resolvable:$true] %s149_s28 }
   0xd   : > { %s1378_s25 = scalar_select %p1158_p8, 1, 0 }
   0xe   : > { %s1379_s26 = scalar_select %p1163_p10, 1, 0 }
   0xf   : > { %p841_p11 = pneg %p1163_p10  ;;  %p854_p13 = scmp.lt.s32.totalorder %s1078_s18, 2 }
  0x10   : > { %s920_s7 = scalar_lea.hbm %s1368_s0, 512 }
  0x11   : > { %p1171_p12 = pnand %p841_p11, %p1373_p5  ;;  %p1178_p0 = pnand %p854_p13, %p1149_p4 }
  0x12   : > { %p921_p1 = scmp.ne.s32.totalorder %s1368_s0, %s920_s7  ;;  %p927_p4 = scmp.lt.u32.totalorder %s920_s7, %s1368_s0 }
  0x13   : > { %s1381_s30 = scalar_select %p1178_p0, 1, 0 }
  0x14   : > { %p922_p2 = pneg %p1171_p12 }
  0x16   : > { %p923_p3 = pnand %p922_p2, %p921_p1 }
  0x18   : > { %p924_p6 = pneg %p923_p3 }
  0x1a   : > { %p929_p7 = pnand %p927_p4, %p924_p6 }
  0x1c   : > { %932 = shalt.err (!%p929_p7)
}
  0x1d   : > { %s933_s12 = scalar_lea.vmem %s150_s28, 512  ;;  %p941_p5 = scmp.lt.s32.totalorder %s150_s28, %s150_s28 }
  0x1e   : > { %p934_p11 = scmp.ne.s32.totalorder %s150_s28, %s933_s12  ;;  %p942_p8 = scmp.lt.s32.totalorder %s933_s12, %s933_s12 }
  0x20   : > { %p936_p13 = pnand %p934_p11, %p922_p2  ;;  %p943_p10 = por %p942_p8, %p941_p5 }
  0x22   : > { %p937_p9 = pneg %p936_p13 }
  0x24   : > { %p944_p0 = pnand %p943_p10, %p937_p9 }
  0x26   : > { %947 = shalt.err (!%p944_p0)
}
  0x27   : > { %s1081_s13 = smov 64   ;;  %s1082_s14 = smov 4  }
  0x28   : > { %844 = dma.hbm_to_vmem [thread:$0]  (!%p1171_p12), %s1368_s0, 512, %s150_s28, [#allocation4], %s1081_s13, %s1081_s13, %s1082_s14  }
  0x29   : > { %s1083_s22 = smov [#allocation6]   ;;  %s948_s6 = scalar_lea.hbm %s1369_s1, 1024 }
  0x2a   : > { %s162_s24 = sshll.u32 %s1083_s22, 4  ;;  %p949_p5 = scmp.ne.s32.totalorder %s1369_s1, %s948_s6  ;;  %s163_s24 = int_to_ptr.vmem [resolvable:$true] %s162_s24 }
  0x2b   : > { %p955_p10 = scmp.lt.u32.totalorder %s948_s6, %s1369_s1 }
  0x2c   : > { %p951_p8 = pnand %p949_p5, %p922_p2 }
  0x2e   : > { %p952_p9 = pneg %p951_p8 }
  0x30   : > { %p957_p0 = pnand %p955_p10, %p952_p9 }
  0x32   : > { %960 = shalt.err (!%p957_p0)
}
  0x33   : > { %s961_s28 = scalar_lea.vmem %s163_s24, 1024  ;;  %p969_p4 = scmp.lt.s32.totalorder %s163_s24, %s163_s24 }
  0x34   : > { %p962_p1 = scmp.ne.s32.totalorder %s163_s24, %s961_s28  ;;  %p970_p7 = scmp.lt.s32.totalorder %s961_s28, %s961_s28 }
  0x36   : > { %p964_p3 = pnand %p962_p1, %p922_p2  ;;  %p971_p11 = por %p970_p7, %p969_p4 }
  0x38   : > { %p965_p6 = pneg %p964_p3 }
  0x3a   : > { %p972_p13 = pnand %p971_p11, %p965_p6 }
  0x3c   : > { %975 = shalt.err (!%p972_p13)
}
  0x3d   : > { %s1084_s11 = smov 128   ;;  %s1085_s12 = smov 8  }
  0x3e   : > { %847 = dma.hbm_to_vmem [thread:$0]  (!%p1171_p12), %s1369_s1, 1024, %s163_s24, [#allocation7], %s1084_s11, %s1084_s11, %s1085_s12  }
  0x3f   : > { %s176_s22 = sand.u32 1, %s1078_s18   ;;  %s178_s27 = sand.u32 1, %s1074_s17  }
  0x40   : > { %s708_s5 = sshll.u32 %s178_s27, 7  ;;  %s746_s6 = sshll.u32 %s1078_s18, 11 }
  0x41   : > { %s1233_s9 = scalar_lea.hbm %s1370_s2, %s746_s6  ;;  %s180_s10 = scalar_lea.vmem [#allocation8], %s708_s5 }
  0x42   : > { %s187_s28 = sshll.u32 %s180_s10, 4  ;;  %s1237_s29 = scalar_lea.sflag [#allocation4], %s176_s22  ;;  %s1235_s28 = int_to_ptr.vmem [resolvable:$true] %s187_s28 }
  0x43   : > { %s976_s24 = scalar_lea.hbm %s1233_s9, 2048  ;;  %p1382_p2 = scmp.ne.s32.totalorder %s1381_s30, 0 }
  0x44   : > { %p977_p12 = scmp.ne.s32.totalorder %s1233_s9, %s976_s24  ;;  %s981_s12 = scalar_lea.hbm %s1370_s2, 4096 }
  0x45   : > { %p978_p5 = pneg %p1382_p2  ;;  %p982_p10 = scmp.lt.u32.totalorder %s1233_s9, %s1370_s2 }
  0x46   : > { %p983_p0 = scmp.lt.u32.totalorder %s981_s12, %s976_s24  ;;  %p985_p3 = scmp.lt.u32.totalorder %s976_s24, %s1233_s9 }
  0x47   : > { %p979_p8 = pnand %p978_p5, %p977_p12 }
  0x48   : > { %p984_p1 = por %p983_p0, %p982_p10 }
  0x49   : > { %p980_p9 = pneg %p979_p8 }
  0x4a   : > { %p986_p6 = por %p985_p3, %p984_p1 }
  0x4c   : > { %p987_p4 = pnand %p986_p6, %p980_p9 }
  0x4e   : > { %990 = shalt.err (!%p987_p4)
}
  0x4f   : > { %s991_s22 = scalar_lea.vmem %s1235_s28, 2048  ;;  %s1086_s27 = smov [#allocation8]  }
  0x50   : > { %p992_p7 = scmp.ne.s32.totalorder %s1235_s28, %s991_s22  ;;  %s996_s5 = sshll.u32 %s1086_s27, 4  ;;  %s997_s5 = int_to_ptr.vmem [resolvable:$false] %s996_s5 }
  0x51   : > { %s998_s6 = scalar_lea.vmem %s997_s5, 4096  ;;  %p999_p12 = scmp.lt.s32.totalorder %s1235_s28, %s997_s5 }
  0x52   : > { %p994_p11 = pnand %p992_p7, %p978_p5  ;;  %p1000_p8 = scmp.lt.s32.totalorder %s998_s6, %s991_s22 }
  0x54   : > { %p995_p13 = pneg %p994_p11  ;;  %p1001_p10 = por %p1000_p8, %p999_p12 }
  0x56   : > { %p1002_p0 = pnand %p1001_p10, %p995_p13 }
  0x58   : > { %1005 = shalt.err (!%p1002_p0)
}
  0x59   : > { %851 = dma.hbm_to_vmem [thread:$0]  (!%p1382_p2), %s1233_s9, 2048, %s1235_s28, %s1237_s29, %s1081_s13, %s1081_s13, %s1082_s14  }
  0x5a   : > { %p1383_p5 = scmp.ne.s32.totalorder %s1379_s26, 0 }
  0x5b   : > { %p1384_p9 = scmp.eq.s32.totalorder (!%p1383_p5), %s1134_s19, 0 }
  0x5c   : > { %205 = sbr.rel (%p1383_p5) target bundleno = 619 (0x26b), region = 36 }
  0x63   : > { %1049 = dma.done.wait (%p1384_p9), [#allocation4], 512   ;;  %p1385_p1 = pmov %p1384_p9 }
  0x65   : > { %1051 = vsyncadd (%p1385_p1), [#allocation4], 4294966784  ;;  %p1386_p3 = pmov %p1385_p1 }
  0x66   : > { %p1387_p6 = pmov %p1385_p1 }
  0x67   : > { %1053 = dma.done.wait (%p1386_p3), [#allocation7], 1024  }
  0x68   : > { %1055 = vsyncadd (%p1387_p6), [#allocation7], 4294966272  ;;  %s215_s30 = sand.u32 1, %s1134_s19   ;;  %s217_s13 = sand.u32 1, %s1070_s16  }
  0x69   : > { %s714_s14 = sshll.u32 %s217_s13, 7  ;;  %s216_s26 = scalar_lea.sflag [#allocation4], %s215_s30 }
  0x6a   : > { %s1280_s7 = scalar_lea.vmem [#allocation8], %s714_s14  ;;  %p1388_p2 = scmp.ne.s32.totalorder %s1378_s25, 0 }
  0x6c   : > { %1057 = dma.done.wait (%p1388_p2), %s216_s26, 2048  }
  0x6d   : > { %1059 = vsyncadd (%p1388_p2), %s216_s26, 4294965248  ;;  %p242_p4 = scmp.lt.s32.totalorder %s1134_s19, 1  ;;  %p1389_p7 = scmp.ne.s32.totalorder %s1134_s19, 0 }
  0x6e   : > { %v250_v0 = vld [vmem:[#allocation6] sm:$0xff] (!%p1389_p7)  ;;  %v251_v1 = vld [vmem:[#allocation6 + $0x8] sm:$0xff] (!%p1389_p7)  ;;  %v252_v2 = vld [vmem:[#allocation6 + $0x10] sm:$0xff] (!%p1389_p7) }
  0x6f   : > { %s1288_s8 = scalar_select %p242_p4, %s1134_s19, 1 }
  0x70   : > { %249 = sbr.rel (%p1389_p7) target bundleno = 119 (0x77), region = 52  ;;  %258 = vst [vmem:[#allocation2] sm:$0xff] (!%p1389_p7), %v250_v0  ;;  %259 = vst [vmem:[#allocation2 + $0x8] sm:$0xff] (!%p1389_p7), %v251_v1  ;;  %v253_v3 = vld [vmem:[#allocation6 + $0x18] sm:$0xff] (!%p1389_p7)  ;;  %v254_v4 = vld [vmem:[#allocation6 + $0x20] sm:$0xff] (!%p1389_p7) }
  0x71   : > { %s244_s28 = scalar_lea.vmem %s1371_s3, %s1288_s8  ;;  %260 = vst [vmem:[#allocation2 + $0x10] sm:$0xff] (!%p1389_p7), %v252_v2  ;;  %v255_v5 = vld [vmem:[#allocation6 + $0x28] sm:$0xff] (!%p1389_p7)  ;;  %261 = vst [vmem:[#allocation2 + $0x18] sm:$0xff] (!%p1389_p7), %v253_v3  ;;  %v256_v6 = vld [vmem:[#allocation6 + $0x30] sm:$0xff] (!%p1389_p7) }
  0x72   : > { %262 = vst [vmem:[#allocation2 + $0x20] sm:$0xff] (!%p1389_p7), %v254_v4  ;;  %263 = vst [vmem:[#allocation2 + $0x28] sm:$0xff] (!%p1389_p7), %v255_v5  ;;  %v257_v7 = vld [vmem:[#allocation6 + $0x38] sm:$0xff] (!%p1389_p7) }
  0x73   : > { %264 = vst [vmem:[#allocation2 + $0x30] sm:$0xff] (!%p1389_p7), %v256_v6  ;;  %265 = vst [vmem:[#allocation2 + $0x38] sm:$0xff] (!%p1389_p7), %v257_v7 }
  0x77 PF: > { %v266_v8 = vld [vmem:[#allocation2] sm:$0xff]  ;;  %v267_v9 = vld [vmem:[#allocation2 + $0x8] sm:$0xff]  ;;  %vm306_vm0 = vcmask 523264   ;;  %v908_v25 = vld [vmem:[%s1280_s7 + $0x50] sm:$0xff]   ;;  %p741_p11 = scmp.ne.s32.totalorder %s1134_s19, 1 }
  0x78   : > { %v268_v10 = vld [vmem:[#allocation2 + $0x10] sm:$0xff]  ;;  %v282_v11 = vpack.c.bf16 %v267_v9, %v266_v8  ;;  %v269_v12 = vld [vmem:[#allocation2 + $0x18] sm:$0xff]  ;;  %v900_v16 = vld [vmem:[#allocation3] sm:$0xff]  }
  0x79   : > { %v283_v13 = vpack.c.bf16 %v269_v12, %v268_v10  ;;  %v270_v14 = vld [vmem:[#allocation2 + $0x20] sm:$0xff]  ;;  %v271_v15 = vld [vmem:[#allocation2 + $0x28] sm:$0xff]  ;;  %803 = vmatprep.mubr.msk.bf16.mxu0 %vm306_vm0, %v900_v16  ;;  %v909_v27 = vld [vmem:[%s1280_s7 + $0x10] sm:$0xff]  }
  0x7a   : > { %795 = vmatprep.subr.bf16.mxu0 %v282_v11  ;;  %v1296_v17 = vpack.c.bf16 %v271_v15, %v270_v14  ;;  %v272_v18 = vld [vmem:[#allocation2 + $0x30] sm:$0xff]  ;;  %v273_v19 = vld [vmem:[#allocation2 + $0x38] sm:$0xff]  ;;  %v904_v20 = vld [vmem:[%s1280_s7 + $0x40] sm:$0xff]  }
  0x7b   : > { %796 = vmatpush3.bf16.msra.mxu0 %v282_v11  ;;  %563 = vmatprep.mubr.bf16.mxu1 %v283_v13  ;;  %v905_v21 = vld [vmem:[%s1280_s7] sm:$0xff]   ;;  %v1302_v22 = vpack.c.bf16 %v273_v19, %v272_v18  ;;  %v906_v23 = vld [vmem:[%s1280_s7 + $0x48] sm:$0xff]   ;;  %v910_v28 = vld [vmem:[%s1280_s7 + $0x58] sm:$0xff]  }
  0x7c   : > { %797 = vmatprep.subr.bf16.mxu0 %v283_v13  ;;  %811 = vmatprep.subr.bf16.mxu1 %v904_v20  ;;  %v907_v24 = vld [vmem:[%s1280_s7 + $0x8] sm:$0xff]   ;;  %v902_v29 = vld [vmem:[#allocation3 + $0x10] sm:$0xff]   ;;  %v911_v30 = vld [vmem:[%s1280_s7 + $0x18] sm:$0xff]  }
  0x7d   : > { %819 = vmatpush3.bf16.msra.mxu1 %v905_v21  ;;  %v901_v26 = vld [vmem:[#allocation3 + $0x8] sm:$0xff]   ;;  %v912_v31 = vld [vmem:[%s1280_s7 + $0x60] sm:$0xff]   ;;  %v903_v33 = vld [vmem:[#allocation3 + $0x18] sm:$0xff]  }
  0x7e   : > { %812 = vmatprep.subr.bf16.mxu1 %v906_v23  ;;  %v913_v32 = vld [vmem:[%s1280_s7 + $0x20] sm:$0xff]   ;;  %v914_v34 = vld [vmem:[%s1280_s7 + $0x68] sm:$0xff]   ;;  %v916_v36 = vld [vmem:[%s1280_s7 + $0x70] sm:$0xff]  }
  0x7f   : > { %798 = vmatpush3.bf16.msra.mxu0 %v283_v13  ;;  %v915_v35 = vld [vmem:[%s1280_s7 + $0x28] sm:$0xff]   ;;  %v917_v37 = vld [vmem:[%s1280_s7 + $0x30] sm:$0xff]   ;;  %v918_v38 = vld [vmem:[%s1280_s7 + $0x78] sm:$0xff]  }
  0x80   : > { %799 = vmatprep.subr.bf16.mxu0 %v1296_v17  ;;  %v919_v39 = vld [vmem:[%s1280_s7 + $0x38] sm:$0xff]   ;;  %v724_v54 = vld [vmem:[%s244_s28] ss:$0 sm:$0xff] }
  0x81   : > { %820 = vmatpush3.bf16.msra.mxu1 %v907_v24 }
  0x82   : > { %813 = vmatprep.subr.bf16.mxu1 %v908_v25 }
  0x83   : > { %800 = vmatpush3.bf16.msra.mxu0 %v1296_v17 }
  0x84   : > { %801 = vmatprep.subr.bf16.mxu0 %v1302_v22 }
  0x85   : > { %821 = vmatpush3.bf16.msra.mxu1 %v909_v27 }
  0x86   : > { %814 = vmatprep.subr.bf16.mxu1 %v910_v28 }
  0x87   : > { %802 = vmatpush3.bf16.msra.mxu0 %v1302_v22 }
  0x88   : > { %755 = vmatprep.subr.bf16.mxu0 %v904_v20 }
  0x89   : > { %822 = vmatpush3.bf16.msra.mxu1 %v911_v30 }
  0x8a   : > { %804 = vmatmul.mubr.msk.bf16.vlgmr.msra.gmra.mrb[0].mxu0 %vm306_vm0, %v901_v26  ;;  %815 = vmatprep.subr.bf16.mxu1 %v912_v31 }
  0x8b   : > { %807 = vmatprep.mubr.msk.bf16.mxu0 %vm306_vm0, %v902_v29  ;;  %756 = vmatpush3.bf16.msra.mxu0 %v905_v21 }
  0x8c   : > { %757 = vmatprep.subr.bf16.mxu0 %v906_v23 }
  0x8d   : > { %823 = vmatpush3.bf16.msra.mxu1 %v913_v32 }
  0x8e   : > { %816 = vmatprep.subr.bf16.mxu1 %v914_v34 }
  0x8f   : > { %758 = vmatpush3.bf16.msra.mxu0 %v907_v24 }
  0x90   : > { %759 = vmatprep.subr.bf16.mxu0 %v908_v25 }
  0x91   : > { %824 = vmatpush3.bf16.msra.mxu1 %v915_v35 }
  0x92   : > { %808 = vmatmul.mubr.msk.bf16.gmra.mrb[4].mxu0 %vm306_vm0, %v903_v33  ;;  %817 = vmatprep.subr.bf16.mxu1 %v916_v36 }
  0x93   : > { %760 = vmatpush3.bf16.msra.mxu0 %v909_v27  ;;  %555 = vmatprep.mubr.bf16.mxu0 %v282_v11 }
  0x94   : > { %761 = vmatprep.subr.bf16.mxu0 %v910_v28 }
  0x95   : > { %825 = vmatpush3.bf16.msra.mxu1 %v917_v37 }
  0x96   : > { %818 = vmatprep.subr.bf16.mxu1 %v918_v38 }
  0x97   : > { %762 = vmatpush3.bf16.msra.mxu0 %v911_v30 }
  0x98   : > { %763 = vmatprep.subr.bf16.mxu0 %v912_v31 }
  0x99   : > { %826 = vmatpush3.bf16.msra.mxu1 %v919_v39 }
  0x9b   : > { %764 = vmatpush3.bf16.msra.mxu0 %v913_v32 }
  0x9c   : > { %765 = vmatprep.subr.bf16.mxu0 %v914_v34 }
  0x9f   : > { %766 = vmatpush3.bf16.msra.mxu0 %v915_v35 }
  0xa0   : > { %767 = vmatprep.subr.bf16.mxu0 %v916_v36 }
  0xa3   : > { %768 = vmatpush3.bf16.msra.mxu0 %v917_v37 }
  0xa4   : > { %769 = vmatprep.subr.bf16.mxu0 %v918_v38 }
  0xa7   : > { %770 = vmatpush3.bf16.msra.mxu0 %v919_v39 }
 0x15d   : > { %v805_v40 = vpop.f32.mrb[0].mxu0 }
 0x15e   : > { %v353_v41 = vpop.f32.mrb[1].mxu0 }
 0x15f   : > { %v806_v42 = vpop.f32.mrb[2].mxu0 }
 0x160   : > { %v385_v43 = vpack.c.bf16 %v806_v42, %v805_v40  ;;  %v356_v44 = vpop.f32.mrb[3].mxu0 }
 0x161   : > { %v384_v45 = vpack.c.bf16 %v356_v44, %v353_v41 }
 0x162   : > { %564 = vmatmul.mubr.bf16.vlgmr.msra.gmra.mrb[0].mxu1 %v385_v43 }
 0x163   : > { %556 = vmatmul.mubr.bf16.vlgmr.msra.gmra.mrb[8].mxu0 %v384_v45  ;;  %571 = vmatprep.mubr.bf16.mxu1 %v1296_v17 }
 0x165   : > { %v809_v46 = vpop.f32.mrb[4].mxu0 }
 0x166   : > { %v369_v47 = vpop.f32.mrb[5].mxu0 }
 0x167   : > { %v810_v48 = vpop.f32.mrb[6].mxu0 }
 0x168   : > { %v387_v49 = vpack.c.bf16 %v810_v48, %v809_v46  ;;  %v372_v50 = vpop.f32.mrb[7].mxu0 }
 0x169   : > { %v386_v51 = vpack.c.bf16 %v372_v50, %v369_v47 }
 0x16b   : > { %572 = vmatmul.mubr.bf16.gmra.mrb[4].mxu1 %v386_v51 }
 0x16c   : > { %579 = vmatprep.mubr.bf16.mxu1 %v1302_v22 }
 0x173   : > { %580 = vmatmul.mubr.bf16.gmra.mrb[8].mxu1 %v387_v49 }
 0x235   : > { %v777_v52 = vpop.f32.mrb[0].mxu1 }
 0x236   : > { %v771_v53 = vpop.f32.mrb[8].mxu0  ;;  %v778_v55 = vpop.f32.mrb[1].mxu1 }
 0x237   : > { %v779_v56 = vadd.f32 %v778_v55, %v777_v52  ;;  %v772_v57 = vpop.f32.mrb[9].mxu0  ;;  %v780_v58 = vpop.f32.mrb[2].mxu1 }
 0x238   : > { %v773_v59 = vadd.f32 %v772_v57, %v771_v53  ;;  %v774_v60 = vpop.f32.mrb[10].mxu0  ;;  %v781_v61 = vpop.f32.mrb[3].mxu1 }
 0x239   : > { %v566_v62 = vadd.f32 %v779_v56, %v724_v54  ;;  %v782_v63 = vadd.f32 %v781_v61, %v780_v58  ;;  %v775_v0 = vpop.f32.mrb[11].mxu0 }
 0x23a   : > { %v558_v1 = vadd.f32 %v773_v59, %v724_v54  ;;  %v776_v2 = vadd.f32 %v775_v0, %v774_v60 }
 0x23b   : > { %v590_v3 = vmax.f32 %v566_v62, 0.0  ;;  %v569_v4 = vadd.f32 %v782_v63, %v724_v54 }
 0x23c   : > { %v588_v5 = vmax.f32 %v558_v1, 0.0  ;;  %v561_v6 = vadd.f32 %v776_v2, %v724_v54 }
 0x23d   : > { %598 = vst [vmem:[#allocation2 + $0x10] sm:$0xff] %v590_v3  ;;  %v591_v7 = vmax.f32 %v569_v4, 0.0  ;;  %610 = vst [vmem:[#allocation9 + $0x10] sm:$0xff] (!%p741_p11), %v590_v3 }
 0x23e   : > { %596 = vst [vmem:[#allocation2] sm:$0xff] %v588_v5  ;;  %v589_v8 = vmax.f32 %v561_v6, 0.0  ;;  %v783_v9 = vpop.f32.mrb[4].mxu1  ;;  %608 = vst [vmem:[#allocation9] sm:$0xff] (!%p741_p11), %v588_v5 }
 0x23f   : > { %599 = vst [vmem:[#allocation2 + $0x18] sm:$0xff] %v591_v7  ;;  %v784_v10 = vpop.f32.mrb[5].mxu1  ;;  %611 = vst [vmem:[#allocation9 + $0x18] sm:$0xff] (!%p741_p11), %v591_v7 }
 0x240   : > { %597 = vst [vmem:[#allocation2 + $0x8] sm:$0xff] %v589_v8  ;;  %v785_v11 = vadd.f32 %v784_v10, %v783_v9  ;;  %v786_v12 = vpop.f32.mrb[6].mxu1  ;;  %609 = vst [vmem:[#allocation9 + $0x8] sm:$0xff] (!%p741_p11), %v589_v8 }
 0x241   : > { %v787_v13 = vpop.f32.mrb[7].mxu1 }
 0x242   : > { %v574_v14 = vadd.f32 %v785_v11, %v724_v54  ;;  %v788_v15 = vadd.f32 %v787_v13, %v786_v12 }
 0x244   : > { %v592_v16 = vmax.f32 %v574_v14, 0.0  ;;  %v577_v17 = vadd.f32 %v788_v15, %v724_v54 }
 0x246   : > { %600 = vst [vmem:[#allocation2 + $0x20] sm:$0xff] %v592_v16  ;;  %v593_v18 = vmax.f32 %v577_v17, 0.0  ;;  %v789_v19 = vpop.f32.mrb[8].mxu1  ;;  %612 = vst [vmem:[#allocation9 + $0x20] sm:$0xff] (!%p741_p11), %v592_v16 }
 0x247   : > { %v790_v20 = vpop.f32.mrb[9].mxu1 }
 0x248   : > { %601 = vst [vmem:[#allocation2 + $0x28] sm:$0xff] %v593_v18  ;;  %v791_v21 = vadd.f32 %v790_v20, %v789_v19  ;;  %v792_v22 = vpop.f32.mrb[10].mxu1  ;;  %613 = vst [vmem:[#allocation9 + $0x28] sm:$0xff] (!%p741_p11), %v593_v18 }
 0x249   : > { %v793_v23 = vpop.f32.mrb[11].mxu1 }
 0x24a   : > { %v582_v24 = vadd.f32 %v791_v21, %v724_v54  ;;  %v794_v25 = vadd.f32 %v793_v23, %v792_v22  ;;  %607 = sbr.rel (%p741_p11) target bundleno = 593 (0x251), region = 56 }
 0x24c   : > { %v594_v26 = vmax.f32 %v582_v24, 0.0  ;;  %v585_v27 = vadd.f32 %v794_v25, %v724_v54 }
 0x24e   : > { %602 = vst [vmem:[#allocation2 + $0x30] sm:$0xff] %v594_v26  ;;  %v595_v28 = vmax.f32 %v585_v27, 0.0  ;;  %614 = vst [vmem:[#allocation9 + $0x30] sm:$0xff] (!%p741_p11), %v594_v26 }
 0x250   : > { %603 = vst [vmem:[#allocation2 + $0x38] sm:$0xff] %v595_v28  ;;  %615 = vst [vmem:[#allocation9 + $0x38] sm:$0xff] (!%p741_p11), %v595_v28 }
 0x251 PF: > { %p857_p13 = scmp.eq.s32.totalorder %s1134_s19, 1  ;;  %s1087_s24 = smov [#allocation9]  }
 0x252   : > { %s622_s18 = sshll.u32 %s1087_s24, 4  ;;  %s623_s18 = int_to_ptr.vmem [resolvable:$true] %s622_s18 }
 0x253   : > { %s1006_s11 = scalar_lea.vmem %s623_s18, 1024  ;;  %p1013_p0 = scmp.lt.s32.totalorder %s623_s18, %s623_s18 }
 0x254   : > { %p1007_p12 = scmp.ne.s32.totalorder %s623_s18, %s1006_s11  ;;  %p1014_p5 = scmp.lt.s32.totalorder %s1006_s11, %s1006_s11 }
 0x256   : > { %p1008_p8 = pnand %p1007_p12, %p857_p13  ;;  %p1015_p9 = por %p1014_p5, %p1013_p0 }
 0x258   : > { %p1009_p10 = pneg %p1008_p8 }
 0x25a   : > { %p1016_p1 = pnand %p1015_p9, %p1009_p10 }
 0x25c   : > { %1019 = shalt.err (!%p1016_p1)
}
 0x25d   : > { %s1020_s21 = scalar_lea.hbm %s1372_s4, 1024 }
 0x25e   : > { %p1021_p3 = scmp.ne.s32.totalorder %s1372_s4, %s1020_s21  ;;  %p1026_p4 = scmp.lt.u32.totalorder %s1020_s21, %s1372_s4 }
 0x260   : > { %p1022_p6 = pnand %p1021_p3, %p857_p13 }
 0x262   : > { %p1023_p2 = pneg %p1022_p6 }
 0x264   : > { %p1028_p7 = pnand %p1026_p4, %p1023_p2 }
 0x266   : > { %1031 = shalt.err (!%p1028_p7)
}
 0x267   : > { %s1088_s30 = smov 128   ;;  %s1089_s13 = smov 8  }
 0x268   : > { %838 = dma.vmem_to_hbm [thread:$0]  (%p857_p13), %s623_s18, 1024, %s1372_s4, [#allocation5], %s1088_s30, %s1088_s30, %s1089_s13  }
 0x269   : > { %1061 = dma.done.wait (%p857_p13), [#allocation5], 1024  }
 0x26a   : > { %1063 = vsyncadd (%p857_p13), [#allocation5], 4294966272 }
 0x26b PF: > { %p14_p11 = scmp.ge.s32.totalorder %s1137_s20, 4   ;;  %s1390_s15 = smov %s1070_s16 }
 0x26c   : > { %s1391_s16 = smov %s1074_s17  ;;  %s1392_s17 = smov %s1147_s23 }
 0x26d   : > { %s1393_s18 = smov %s1137_s20  ;;  %16 = sbr.rel (!%p14_p11) target bundleno = 4 (0x4), region = 91 }
 0x274   :  { %638 = vsyncpa [#allocation4], 1 }
 0x275   :  { %640 = vsyncpa [#allocation4 + $0x1], 1 }
 0x276   :  { %641 = vsyncpa [#allocation7], 1 }
 0x277   :  { %642 = vsyncpa [#allocation5], 1 }
 0x278   :  { %644 = vsyncpa [#allocation5 + $0x1], 1 }

</bundles_post_ra>
